<compile_context>
chip_gen: v6e
topology: v6e:2x2x1
jax: 0.10.0
libtpu: 0.0.40
codegen_flags: <defaults>
</compile_context>

<pallas_src>
from functools import partial

import jax
import jax.numpy as jnp
from jax.experimental import pallas as pl
from jax.experimental.pallas import tpu as pltpu

HIDDEN = 256
LANE = 128
SUBLANE = 8
MAX_BATCH_TILE = 1024   # amortizes per-grid-step pipeline overhead (v5e/v6e)
MIN_SPLIT_ROWS = 256    # only split the grid across cores if tiles still fill the MXU
SMALL_BATCH_CUTOFF = 128  # below this, the XLA dot chain beats the Pallas launch


def _round_up(x, m):
    return (x + m - 1) // m * m


def _choose_batch_tiling(B):
    """Balanced batch tiles: pad waste < SUBLANE rows per tile; even grid when big."""
    n_tiles = max(1, -(-B // MAX_BATCH_TILE))
    if n_tiles == 1 and B >= 2 * MIN_SPLIT_ROWS:
        n_tiles = 2                                   # v7x megacore: use both cores
    elif n_tiles > 1 and n_tiles % 2 == 1 and B >= (n_tiles + 1) * MIN_SPLIT_ROWS:
        n_tiles += 1                                  # prefer an even grid
    tb = _round_up(-(-B // n_tiles), SUBLANE)
    return tb, tb * n_tiles, n_tiles


def _mlp_kernel(obs_ref,
                w1_ref, b1_ref,
                w2_ref, b2_ref,
                w3_ref, b3_ref,
                w4_ref, b4_ref,
                out_ref):
    # obs streamed in f32, cast to bf16 in-kernel (VPU); all dots accumulate in f32.
    x = obs_ref[...].astype(jnp.bfloat16)                          # (TB, obs_dim)

    h = jnp.dot(x, w1_ref[...], preferred_element_type=jnp.float32)
    h = jnp.maximum(h + b1_ref[...], 0.0).astype(jnp.bfloat16)     # Dropout == identity (eval)

    h = jnp.dot(h, w2_ref[...], preferred_element_type=jnp.float32)
    h = jnp.maximum(h + b2_ref[...], 0.0).astype(jnp.bfloat16)

    h = jnp.dot(h, w3_ref[...], preferred_element_type=jnp.float32)
    h = jnp.maximum(h + b3_ref[...], 0.0).astype(jnp.bfloat16)

    y = jnp.dot(h, w4_ref[...], preferred_element_type=jnp.float32)
    out_ref[...] = (y + b4_ref[...]).astype(out_ref.dtype)         # lane-dense bf16 store


def pack_params(params):
    """One-time repack of f32 params into MXU-ready bf16 (hoisted out of the call path)."""
    obs_dim = params["w1"].shape[0]
    act_dim = params["w4"].shape[1]
    act_dim_p = _round_up(act_dim, LANE)
    packed = {
        "w1": params["w1"].astype(jnp.bfloat16),                   # (obs_dim, 256) un-padded
        "w2": params["w2"].astype(jnp.bfloat16),
        "w3": params["w3"].astype(jnp.bfloat16),
        "w4": jnp.zeros((HIDDEN, act_dim_p), jnp.bfloat16).at[:, :act_dim].set(
            params["w4"].astype(jnp.bfloat16)),
        "b1": params["b1"].astype(jnp.float32),                    # (1, 256)
        "b2": params["b2"].astype(jnp.float32),
        "b3": params["b3"].astype(jnp.float32),
        "b4": jnp.zeros((1, act_dim_p), jnp.float32).at[:, :act_dim].set(
            params["b4"].astype(jnp.float32)),
    }
    return packed, act_dim


@partial(jax.jit, static_argnames=("act_dim", "force_pallas"))
def network_forward(obs, packed, act_dim, force_pallas=False):
    """obs: (B, obs_dim) float32. packed: output of pack_params. Returns (B, act_dim) f32."""
    B, obs_dim = obs.shape
    act_dim_p = packed["w4"].shape[1]

    # Small-batch fast path: plain XLA dot chain on the same packed bf16 weights.
    if not force_pallas and B < SMALL_BATCH_CUTOFF:
        h = obs.astype(jnp.bfloat16)
        h = jnp.maximum(jnp.dot(h, packed["w1"], preferred_element_type=jnp.float32)
                        + packed["b1"], 0.0).astype(jnp.bfloat16)
        h = jnp.maximum(jnp.dot(h, packed["w2"], preferred_element_type=jnp.float32)
                        + packed["b2"], 0.0).astype(jnp.bfloat16)
        h = jnp.maximum(jnp.dot(h, packed["w3"], preferred_element_type=jnp.float32)
                        + packed["b3"], 0.0).astype(jnp.bfloat16)
        y = jnp.dot(h, packed["w4"], preferred_element_type=jnp.float32) + packed["b4"]
        return y[:, :act_dim].astype(jnp.float32)

    tb, B_p, n_tiles = _choose_batch_tiling(B)
    obs_p = obs if B_p == B else jnp.pad(obs, ((0, B_p - B), (0, 0)))

    flops = 2 * B_p * (obs_dim * HIDDEN + 2 * HIDDEN * HIDDEN + HIDDEN * act_dim_p)
    bytes_accessed = (
        2 * (obs_dim * HIDDEN + 2 * HIDDEN * HIDDEN + HIDDEN * act_dim_p)   # bf16 weights
        + 4 * (3 * HIDDEN + act_dim_p)                                      # f32 biases
        + B_p * (4 * obs_dim + 2 * act_dim_p))                              # f32 obs + bf16 out

    out = pl.pallas_call(
        _mlp_kernel,
        out_shape=jax.ShapeDtypeStruct((B_p, act_dim_p), jnp.bfloat16),
        grid=(n_tiles,),
        in_specs=[
            # obs: streamed over the batch grid; full (un-padded) last dim.
            pl.BlockSpec((tb, obs_dim), lambda i: (i, 0)),
            # weights / biases: same block every step -> resident in VMEM.
            pl.BlockSpec((obs_dim, HIDDEN), lambda i: (0, 0)),
            pl.BlockSpec((1, HIDDEN), lambda i: (0, 0)),
            pl.BlockSpec((HIDDEN, HIDDEN), lambda i: (0, 0)),
            pl.BlockSpec((1, HIDDEN), lambda i: (0, 0)),
            pl.BlockSpec((HIDDEN, HIDDEN), lambda i: (0, 0)),
            pl.BlockSpec((1, HIDDEN), lambda i: (0, 0)),
            pl.BlockSpec((HIDDEN, act_dim_p), lambda i: (0, 0)),
            pl.BlockSpec((1, act_dim_p), lambda i: (0, 0)),
        ],
        out_specs=pl.BlockSpec((tb, act_dim_p), lambda i: (i, 0)),
        compiler_params=pltpu.CompilerParams(
            dimension_semantics=("parallel",),        # megacore on v7x; no-op on v5e/v6e
            vmem_limit_bytes=32 * 1024 * 1024),
        cost_estimate=pl.CostEstimate(
            flops=flops, transcendentals=0, bytes_accessed=bytes_accessed),
    )(obs_p, packed["w1"], packed["b1"], packed["w2"], packed["b2"],
      packed["w3"], packed["b3"], packed["w4"], packed["b4"])

    return out[:B, :act_dim].astype(jnp.float32)


def init_params(key, obs_dim, act_dim):
    """Deterministic synthetic parameters (PyTorch-style uniform fan-in init)."""
    dims = [(obs_dim, HIDDEN), (HIDDEN, HIDDEN), (HIDDEN, HIDDEN), (HIDDEN, act_dim)]
    params = {}
    for i, (fan_in, fan_out) in enumerate(dims, start=1):
        key, kw, kb = jax.random.split(key, 3)
        bound = 1.0 / jnp.sqrt(jnp.float32(fan_in))
        params[f"w{i}"] = jax.random.uniform(
            kw, (fan_in, fan_out), jnp.float32, -bound, bound)
        # Biases kept 2D (1, fan_out) for clean lane-aligned broadcast in-kernel.
        params[f"b{i}"] = jax.random.uniform(
            kb, (1, fan_out), jnp.float32, -bound, bound)
    return params


def reference_forward(obs, params):
    """Pure-JAX f32 reference (eval-mode dropout = identity)."""
    h = jnp.maximum(obs @ params["w1"] + params["b1"], 0.0)
    h = jnp.maximum(h @ params["w2"] + params["b2"], 0.0)
    h = jnp.maximum(h @ params["w3"] + params["b3"], 0.0)
    return h @ params["w4"] + params["b4"]


if __name__ == "__main__":
    key = jax.random.PRNGKey(0)
    k_obs, k_params = jax.random.split(key)

    batch = 2
    obs_dim = 16
    act_dim = 8

    obs = jax.random.normal(k_obs, (batch, obs_dim), dtype=jnp.float32)
    params = init_params(k_params, obs_dim, act_dim)

    # One-time weight packing (bf16 cast + lane padding) outside the call path.
    packed, packed_act_dim = pack_params(params)
    assert packed_act_dim == act_dim

    ref = reference_forward(obs, params)

    # Pallas path (forced so the kernel runs even at this tiny demo batch).
    out = jax.block_until_ready(
        network_forward(obs, packed, act_dim=act_dim, force_pallas=True))
    assert out.shape == (batch, act_dim)
    # bf16 MXU operands (f32 accumulation) -> loosened tolerance vs f32 reference.
    assert jnp.allclose(out, ref, atol=3e-2, rtol=3e-2), float(jnp.max(jnp.abs(out - ref)))

    # Small-batch fast path (XLA dot chain on the same packed weights).
    out_fast = jax.block_until_ready(network_forward(obs, packed, act_dim=act_dim))
    assert out_fast.shape == (batch, act_dim)
    assert jnp.allclose(out_fast, ref, atol=3e-2, rtol=3e-2)

    print("KERNEL_OK")
</pallas_src>

<mosaic_0001>
module attributes {stable_mosaic.version = 11 : i64} {
  func.func @_mlp_kernel(%arg0: i32, %arg1: memref<8x16xf32, #tpu.memory_space<vmem>>, %arg2: memref<16x256xbf16, #tpu.memory_space<vmem>>, %arg3: memref<1x256xf32, #tpu.memory_space<vmem>>, %arg4: memref<256x256xbf16, #tpu.memory_space<vmem>>, %arg5: memref<1x256xf32, #tpu.memory_space<vmem>>, %arg6: memref<256x256xbf16, #tpu.memory_space<vmem>>, %arg7: memref<1x256xf32, #tpu.memory_space<vmem>>, %arg8: memref<256x128xbf16, #tpu.memory_space<vmem>>, %arg9: memref<1x128xf32, #tpu.memory_space<vmem>>, %arg10: memref<8x128xbf16, #tpu.memory_space<vmem>>) attributes {dimension_semantics = [#tpu.dimension_semantics<parallel>], iteration_bounds = array<i64: 1>, scalar_prefetch = 0 : i64, scratch_operands = 0 : i64, tpu.core_type = #tpu.core_type<tc>, window_params = [{transform_indices = @transform_0, window_bounds = array<i64: 8, 16>}, {pipeline_mode = #tpu.pipeline_mode<synchronous>, transform_indices = @transform_1, window_bounds = array<i64: 16, 256>}, {pipeline_mode = #tpu.pipeline_mode<synchronous>, transform_indices = @transform_2, window_bounds = array<i64: 1, 256>}, {pipeline_mode = #tpu.pipeline_mode<synchronous>, transform_indices = @transform_3, window_bounds = array<i64: 256, 256>}, {pipeline_mode = #tpu.pipeline_mode<synchronous>, transform_indices = @transform_4, window_bounds = array<i64: 1, 256>}, {pipeline_mode = #tpu.pipeline_mode<synchronous>, transform_indices = @transform_5, window_bounds = array<i64: 256, 256>}, {pipeline_mode = #tpu.pipeline_mode<synchronous>, transform_indices = @transform_6, window_bounds = array<i64: 1, 256>}, {pipeline_mode = #tpu.pipeline_mode<synchronous>, transform_indices = @transform_7, window_bounds = array<i64: 256, 128>}, {pipeline_mode = #tpu.pipeline_mode<synchronous>, transform_indices = @transform_8, window_bounds = array<i64: 1, 128>}, {transform_indices = @transform_9, window_bounds = array<i64: 8, 128>}]} {
    %c0 = arith.constant 0 : index
    %c0_0 = arith.constant 0 : index
    %0 = vector.load %arg1[%c0, %c0_0] : memref<8x16xf32, #tpu.memory_space<vmem>>, vector<8x16xf32>
    %1 = arith.truncf %0 : vector<8x16xf32> to vector<8x16xbf16>
    %c0_1 = arith.constant 0 : index
    %c0_2 = arith.constant 0 : index
    %2 = vector.load %arg2[%c0_1, %c0_2] : memref<16x256xbf16, #tpu.memory_space<vmem>>, vector<16x256xbf16>
    %cst = arith.constant dense<0.000000e+00> : vector<8x256xf32>
    %3 = tpu.matmul %1, %2, %cst {dimension_numbers = #tpu.dot_dimension_numbers<[1], [0], [0], [1], [0, 0, 1, 1], [], []>} : vector<8x16xbf16>, vector<16x256xbf16>, vector<8x256xf32> -> vector<8x256xf32>
    %c0_3 = arith.constant 0 : index
    %c0_4 = arith.constant 0 : index
    %4 = vector.load %arg3[%c0_3, %c0_4] : memref<1x256xf32, #tpu.memory_space<vmem>>, vector<1x256xf32>
    %5 = vector.broadcast %4 : vector<1x256xf32> to vector<8x256xf32>
    %6 = arith.addf %3, %5 : vector<8x256xf32>
    %cst_5 = arith.constant 0.000000e+00 : f32
    %7 = vector.broadcast %cst_5 : f32 to vector<8x256xf32>
    %8 = arith.maximumf %6, %7 : vector<8x256xf32>
    %9 = arith.truncf %8 : vector<8x256xf32> to vector<8x256xbf16>
    %c0_6 = arith.constant 0 : index
    %c0_7 = arith.constant 0 : index
    %10 = vector.load %arg4[%c0_6, %c0_7] : memref<256x256xbf16, #tpu.memory_space<vmem>>, vector<256x256xbf16>
    %cst_8 = arith.constant dense<0.000000e+00> : vector<8x256xf32>
    %11 = tpu.matmul %9, %10, %cst_8 {dimension_numbers = #tpu.dot_dimension_numbers<[1], [0], [0], [1], [0, 0, 1, 1], [], []>} : vector<8x256xbf16>, vector<256x256xbf16>, vector<8x256xf32> -> vector<8x256xf32>
    %c0_9 = arith.constant 0 : index
    %c0_10 = arith.constant 0 : index
    %12 = vector.load %arg5[%c0_9, %c0_10] : memref<1x256xf32, #tpu.memory_space<vmem>>, vector<1x256xf32>
    %13 = vector.broadcast %12 : vector<1x256xf32> to vector<8x256xf32>
    %14 = arith.addf %11, %13 : vector<8x256xf32>
    %cst_11 = arith.constant 0.000000e+00 : f32
    %15 = vector.broadcast %cst_11 : f32 to vector<8x256xf32>
    %16 = arith.maximumf %14, %15 : vector<8x256xf32>
    %17 = arith.truncf %16 : vector<8x256xf32> to vector<8x256xbf16>
    %c0_12 = arith.constant 0 : index
    %c0_13 = arith.constant 0 : index
    %18 = vector.load %arg6[%c0_12, %c0_13] : memref<256x256xbf16, #tpu.memory_space<vmem>>, vector<256x256xbf16>
    %cst_14 = arith.constant dense<0.000000e+00> : vector<8x256xf32>
    %19 = tpu.matmul %17, %18, %cst_14 {dimension_numbers = #tpu.dot_dimension_numbers<[1], [0], [0], [1], [0, 0, 1, 1], [], []>} : vector<8x256xbf16>, vector<256x256xbf16>, vector<8x256xf32> -> vector<8x256xf32>
    %c0_15 = arith.constant 0 : index
    %c0_16 = arith.constant 0 : index
    %20 = vector.load %arg7[%c0_15, %c0_16] : memref<1x256xf32, #tpu.memory_space<vmem>>, vector<1x256xf32>
    %21 = vector.broadcast %20 : vector<1x256xf32> to vector<8x256xf32>
    %22 = arith.addf %19, %21 : vector<8x256xf32>
    %cst_17 = arith.constant 0.000000e+00 : f32
    %23 = vector.broadcast %cst_17 : f32 to vector<8x256xf32>
    %24 = arith.maximumf %22, %23 : vector<8x256xf32>
    %25 = arith.truncf %24 : vector<8x256xf32> to vector<8x256xbf16>
    %c0_18 = arith.constant 0 : index
    %c0_19 = arith.constant 0 : index
    %26 = vector.load %arg8[%c0_18, %c0_19] : memref<256x128xbf16, #tpu.memory_space<vmem>>, vector<256x128xbf16>
    %cst_20 = arith.constant dense<0.000000e+00> : vector<8x128xf32>
    %27 = tpu.matmul %25, %26, %cst_20 {dimension_numbers = #tpu.dot_dimension_numbers<[1], [0], [0], [1], [0, 0, 1, 1], [], []>} : vector<8x256xbf16>, vector<256x128xbf16>, vector<8x128xf32> -> vector<8x128xf32>
    %c0_21 = arith.constant 0 : index
    %c0_22 = arith.constant 0 : index
    %28 = vector.load %arg9[%c0_21, %c0_22] : memref<1x128xf32, #tpu.memory_space<vmem>>, vector<1x128xf32>
    %29 = vector.broadcast %28 : vector<1x128xf32> to vector<8x128xf32>
    %30 = arith.addf %27, %29 : vector<8x128xf32>
    %31 = arith.truncf %30 : vector<8x128xf32> to vector<8x128xbf16>
    %c0_23 = arith.constant 0 : index
    %c0_24 = arith.constant 0 : index
    %32 = vector.load %arg10[%c0_23, %c0_24] : memref<8x128xbf16, #tpu.memory_space<vmem>>, vector<8x128xbf16>
    tpu.vector_store %arg10[%c0_23, %c0_24], %31 {strides = array<i32>} : memref<8x128xbf16, #tpu.memory_space<vmem>>, vector<8x128xbf16>,
    return
  }
  func.func @transform_0(%arg0: i32) -> (i32, i32) {
    %c0_i32 = arith.constant 0 : i32
    %c0_i32_0 = arith.constant 0 : i32
    return %arg0, %c0_i32 : i32, i32
  }
  func.func @transform_1(%arg0: i32) -> (i32, i32) {
    %c0_i32 = arith.constant 0 : i32
    %c0_i32_0 = arith.constant 0 : i32
    %c0_i32_1 = arith.constant 0 : i32
    return %c0_i32, %c0_i32_0 : i32, i32
  }
  func.func @transform_2(%arg0: i32) -> (i32, i32) {
    %c0_i32 = arith.constant 0 : i32
    %c0_i32_0 = arith.constant 0 : i32
    %c0_i32_1 = arith.constant 0 : i32
    return %c0_i32, %c0_i32_0 : i32, i32
  }
  func.func @transform_3(%arg0: i32) -> (i32, i32) {
    %c0_i32 = arith.constant 0 : i32
    %c0_i32_0 = arith.constant 0 : i32
    %c0_i32_1 = arith.constant 0 : i32
    return %c0_i32, %c0_i32_0 : i32, i32
  }
  func.func @transform_4(%arg0: i32) -> (i32, i32) {
    %c0_i32 = arith.constant 0 : i32
    %c0_i32_0 = arith.constant 0 : i32
    %c0_i32_1 = arith.constant 0 : i32
    return %c0_i32, %c0_i32_0 : i32, i32
  }
  func.func @transform_5(%arg0: i32) -> (i32, i32) {
    %c0_i32 = arith.constant 0 : i32
    %c0_i32_0 = arith.constant 0 : i32
    %c0_i32_1 = arith.constant 0 : i32
    return %c0_i32, %c0_i32_0 : i32, i32
  }
  func.func @transform_6(%arg0: i32) -> (i32, i32) {
    %c0_i32 = arith.constant 0 : i32
    %c0_i32_0 = arith.constant 0 : i32
    %c0_i32_1 = arith.constant 0 : i32
    return %c0_i32, %c0_i32_0 : i32, i32
  }
  func.func @transform_7(%arg0: i32) -> (i32, i32) {
    %c0_i32 = arith.constant 0 : i32
    %c0_i32_0 = arith.constant 0 : i32
    %c0_i32_1 = arith.constant 0 : i32
    return %c0_i32, %c0_i32_0 : i32, i32
  }
  func.func @transform_8(%arg0: i32) -> (i32, i32) {
    %c0_i32 = arith.constant 0 : i32
    %c0_i32_0 = arith.constant 0 : i32
    %c0_i32_1 = arith.constant 0 : i32
    return %c0_i32, %c0_i32_0 : i32, i32
  }
  func.func @transform_9(%arg0: i32) -> (i32, i32) {
    %c0_i32 = arith.constant 0 : i32
    %c0_i32_0 = arith.constant 0 : i32
    return %arg0, %c0_i32 : i32, i32
  }
}

</mosaic_0001>

<bundles_post_ra>
// kernel: network_forward.1
= control target key start
LH: loop header
LB: loop body
LE: loop exit
PB: predicated region body
PF: predicated region fallthrough
CT: control target
= control target key end

     0   :  { %14 = vsyncpa [#allocation3], 0  ;;  %s1294_s0 = inlined_call_operand.vmem [shape: f32[8,16], index: 0, kind: input, shape index: {}]   ;;  %s1295_s1 = inlined_call_operand.vmem [shape: bf16[16,256], index: 1, kind: input, shape index: {}]   ;;  %s1296_s2 = inlined_call_operand.vmem [shape: f32[1,256], index: 2, kind: input, shape index: {}]   ;;  %s1297_s3 = inlined_call_operand.hbm [shape: bf16[256,256], index: 3, kind: input, shape index: {}]   ;;  %s1298_s4 = inlined_call_operand.vmem [shape: f32[1,256], index: 4, kind: input, shape index: {}]   ;;  %s1299_s5 = inlined_call_operand.hbm [shape: bf16[256,256], index: 5, kind: input, shape index: {}]   ;;  %s1300_s6 = inlined_call_operand.hbm [shape: f32[1,256], index: 6, kind: input, shape index: {}]   ;;  %s1301_s7 = inlined_call_operand.hbm [shape: bf16[256,128], index: 7, kind: input, shape index: {}]   ;;  %s1302_s8 = inlined_call_operand.hbm [shape: f32[1,128], index: 8, kind: input, shape index: {}]   ;;  %s1303_s9 = inlined_call_operand.vmem [shape: bf16[8,128], index: 9, kind: output, shape index: {}]  }
   0x1   :  { %15 = vsyncpa [#allocation5], 0 }
   0x2   :  { %16 = vsyncpa [#allocation8], 0  ;;  %s1191_s30 = smov [#allocation4]   ;;  %s1192_s11 = smov [#allocation7]  }
   0x3   :  { %s42_s10 = sshll.u32 %s1191_s30, 4  ;;  %s64_s12 = sshll.u32 %s1192_s11, 4  ;;  %s43_s10 = int_to_ptr.vmem [resolvable:$true] %s42_s10  ;;  %s65_s12 = int_to_ptr.vmem [resolvable:$true] %s64_s12 }
   0x4   :  { %s1093_s13 = scalar_lea.vmem %s43_s10, 4096  ;;  %p1098_p1 = scmp.lt.s32.totalorder %s43_s10, %s43_s10 }
   0x5   :  { %p1094_p0 = scmp.ne.s32.totalorder %s43_s10, %s1093_s13  ;;  %p1099_p2 = scmp.lt.s32.totalorder %s1093_s13, %s1093_s13 }
   0x7   :  { %p1100_p3 = por %p1099_p2, %p1098_p1 }
   0x9   :  { %p1101_p4 = pnand %p1100_p3, %p1094_p0 }
   0xb   :  { %1104 = shalt.err (!%p1101_p4)
}
   0xc   :  { %s1193_s14 = smov 128   ;;  %s1194_s15 = smov 8  }
   0xd   :  { %48 = dma.hbm_to_vmem [thread:$0]  %s1299_s5, 4096, %s43_s10, [#allocation5], %s1193_s14, %s1193_s14, %s1194_s15  }
   0xe   :  { %s1113_s18 = scalar_lea.vmem %s65_s12, 2048  ;;  %p1118_p6 = scmp.lt.s32.totalorder %s65_s12, %s65_s12 }
   0xf   :  { %p1114_p5 = scmp.ne.s32.totalorder %s65_s12, %s1113_s18  ;;  %p1119_p7 = scmp.lt.s32.totalorder %s1113_s18, %s1113_s18 }
  0x11   :  { %p1120_p8 = por %p1119_p7, %p1118_p6 }
  0x13   :  { %p1121_p9 = pnand %p1120_p8, %p1114_p5 }
  0x15   :  { %1124 = shalt.err (!%p1121_p9)
}
  0x16   :  { %s1195_s19 = smov 64   ;;  %s1196_s20 = smov 4  }
  0x17   :  { %70 = dma.hbm_to_vmem [thread:$0]  %s1301_s7, 2048, %s65_s12, [#allocation8], %s1195_s19, %s1195_s19, %s1196_s20  }
  0x18   :  { %s1197_s23 = smov [#allocation2]   ;;  %s1198_s25 = smov [#allocation6]  }
  0x19   :  { %s28_s24 = sshll.u32 %s1197_s23, 4  ;;  %s55_s26 = sshll.u32 %s1198_s25, 4  ;;  %s29_s24 = int_to_ptr.vmem [resolvable:$true] %s28_s24  ;;  %s56_s26 = int_to_ptr.vmem [resolvable:$true] %s55_s26 }
  0x1a   :  { %s1133_s5 = scalar_lea.vmem %s29_s24, 4096  ;;  %p1138_p11 = scmp.lt.s32.totalorder %s29_s24, %s29_s24 }
  0x1b   :  { %p1134_p10 = scmp.ne.s32.totalorder %s29_s24, %s1133_s5  ;;  %p1139_p12 = scmp.lt.s32.totalorder %s1133_s5, %s1133_s5 }
  0x1d   :  { %p1140_p13 = por %p1139_p12, %p1138_p11 }
  0x1f   :  { %p1141_p0 = pnand %p1140_p13, %p1134_p10 }
  0x21   :  { %1144 = shalt.err (!%p1141_p0)
}
  0x22   :  { %34 = dma.hbm_to_vmem [thread:$0]  %s1297_s3, 4096, %s29_s24, [#allocation3], %s1193_s14, %s1193_s14, %s1194_s15  }
  0x23   :  { %s1153_s29 = scalar_lea.vmem %s56_s26, 32  ;;  %p1158_p2 = scmp.lt.s32.totalorder %s56_s26, %s56_s26 }
  0x24   :  { %p1154_p1 = scmp.ne.s32.totalorder %s56_s26, %s1153_s29  ;;  %p1159_p3 = scmp.lt.s32.totalorder %s1153_s29, %s1153_s29 }
  0x26   :  { %p1160_p4 = por %p1159_p3, %p1158_p2 }
  0x28   :  { %p1161_p5 = pnand %p1160_p4, %p1154_p1 }
  0x2a   :  { %1164 = shalt.err (!%p1161_p5)
}
  0x2b   :  { %58 = dma.hbm_to_vmem [thread:$0]  %s1300_s6, 32, %s56_s26, [#allocation5]  }
  0x2c   :  { %s1199_s10 = smov [#allocation9]  }
  0x2d   :  { %s77_s11 = sshll.u32 %s1199_s10, 4  ;;  %s78_s11 = int_to_ptr.vmem [resolvable:$true] %s77_s11 }
  0x2e   :  { %s1173_s12 = scalar_lea.vmem %s78_s11, 16  ;;  %s1177_s13 = scalar_lea.vmem %s78_s11, 32 }
  0x2f   :  { %p1174_p6 = scmp.ne.s32.totalorder %s78_s11, %s1173_s12  ;;  %p1178_p7 = scmp.lt.s32.totalorder %s78_s11, %s78_s11 }
  0x30   :  { %p1179_p8 = scmp.lt.s32.totalorder %s1177_s13, %s1173_s12 }
  0x32   :  { %p1180_p9 = por %p1179_p8, %p1178_p7 }
  0x34   :  { %p1181_p10 = pnand %p1180_p9, %p1174_p6 }
  0x36   :  { %1184 = shalt.err (!%p1181_p10)
}
  0x37   :  { %80 = dma.hbm_to_vmem [thread:$0]  %s1302_s8, 16, %s78_s11, [#allocation8]  }
  0x38   :  { %1185 = dma.done.wait [#allocation3], 4096  }
  0x39   :  { %1186 = vsyncadd [#allocation3], 4294963200 }
  0x3a   :  { %1187 = dma.done.wait [#allocation5], 4128  }
  0x3b   :  { %1188 = vsyncadd [#allocation5], 4294963168 }
  0x3c   :  { %1189 = dma.done.wait [#allocation8], 2064  }
  0x3d   :  { %1190 = vsyncadd [#allocation8], 4294965232  ;;  %v1200_v0 = vmov 0   ;;  %v970_v1 = vld [vmem:[%s1295_s1 + $0x4] ss:$8 sps:$4 sm:$0xff]   ;;  %vm123_vm0 = vcmask 130048  }
  0x3e   :  { %159 = vmatprep.mubr.bf16.mxu0 %v1200_v0  ;;  %v972_v2 = vld [vmem:[%s1295_s1] ss:$8 sps:$4 sm:$0xff]   ;;  %141 = vmatprep.subr.bf16.mxu0 %v970_v1  ;;  %v973_v5 = vld [vmem:[#allocation2 + $0x74] ss:$8 sps:$4 sm:$0xff]   ;;  %v975_v6 = vld [vmem:[#allocation2 + $0x70] ss:$8 sps:$4 sm:$0xff]   ;;  %v103_v1 = vlaneseq }
  0x3f   :  { %v97_v3 = vld [vmem:[%s1294_s0] sm:$0xff]  ;;  %142 = vmatpush1.bf16.msra.mxu0 %v972_v2  ;;  %376 = vmatprep.subr.bf16.mxu1 %v973_v5  ;;  %v979_v9 = vld [vmem:[#allocation2 + $0x54] ss:$8 sps:$4 sm:$0xff]   ;;  %v981_v10 = vld [vmem:[#allocation2 + $0x50] ss:$8 sps:$4 sm:$0xff]  }
  0x40   :  { %v98_v4 = vpack.c.bf16 %v97_v3, %v97_v3  ;;  %v976_v7 = vld [vmem:[#allocation2 + $0x64] ss:$8 sps:$4 sm:$0xff]   ;;  %377 = vmatpush1.bf16.msra.mxu1 %v975_v6  ;;  %v978_v8 = vld [vmem:[#allocation2 + $0x60] ss:$8 sps:$4 sm:$0xff]   ;;  %v985_v13 = vld [vmem:[#allocation2 + $0x34] ss:$8 sps:$4 sm:$0xff]  }
  0x41   :  { %378 = vmatprep.subr.bf16.mxu1 %v976_v7  ;;  %v982_v11 = vld [vmem:[#allocation2 + $0x44] ss:$8 sps:$4 sm:$0xff]   ;;  %v984_v12 = vld [vmem:[#allocation2 + $0x40] ss:$8 sps:$4 sm:$0xff]   ;;  %v987_v14 = vld [vmem:[#allocation2 + $0x30] ss:$8 sps:$4 sm:$0xff]  }
  0x42   :  { %856 = vmatmul.mubr.msk.bf16.vlgmr.msra.gmra.mxu0 %vm123_vm0, %v98_v4  ;;  %v988_v15 = vld [vmem:[#allocation2 + $0x24] ss:$8 sps:$4 sm:$0xff]   ;;  %v990_v16 = vld [vmem:[#allocation2 + $0x20] ss:$8 sps:$4 sm:$0xff]   ;;  %v991_v17 = vld [vmem:[#allocation2 + $0x14] ss:$8 sps:$4 sm:$0xff]  }
  0x43   :  { %v993_v18 = vld [vmem:[#allocation2 + $0x10] ss:$8 sps:$4 sm:$0xff]   ;;  %v994_v19 = vld [vmem:[#allocation2 + $0x4] ss:$8 sps:$4 sm:$0xff]   ;;  %v996_v20 = vld [vmem:[#allocation2] ss:$8 sps:$4 sm:$0xff]  }
  0x44   :  { %379 = vmatpush1.bf16.msra.mxu1 %v978_v8  ;;  %v997_v21 = vld [vmem:[#allocation2 + $0xf4] ss:$8 sps:$4 sm:$0xff]   ;;  %v999_v22 = vld [vmem:[#allocation2 + $0xf0] ss:$8 sps:$4 sm:$0xff]   ;;  %v1000_v23 = vld [vmem:[#allocation2 + $0xe4] ss:$8 sps:$4 sm:$0xff]  }
  0x45   :  { %380 = vmatprep.subr.bf16.mxu1 %v979_v9  ;;  %v1002_v24 = vld [vmem:[#allocation2 + $0xe0] ss:$8 sps:$4 sm:$0xff]   ;;  %v1003_v25 = vld [vmem:[#allocation2 + $0xd4] ss:$8 sps:$4 sm:$0xff]   ;;  %v1005_v26 = vld [vmem:[#allocation2 + $0xd0] ss:$8 sps:$4 sm:$0xff]  }
  0x46   :  { %v1006_v27 = vld [vmem:[#allocation2 + $0xc4] ss:$8 sps:$4 sm:$0xff]   ;;  %v1008_v28 = vld [vmem:[#allocation2 + $0xc0] ss:$8 sps:$4 sm:$0xff]   ;;  %v1009_v29 = vld [vmem:[#allocation2 + $0xb4] ss:$8 sps:$4 sm:$0xff]  }
  0x47   :  { %v1011_v30 = vld [vmem:[#allocation2 + $0xb0] ss:$8 sps:$4 sm:$0xff]   ;;  %v1012_v31 = vld [vmem:[#allocation2 + $0xa4] ss:$8 sps:$4 sm:$0xff]   ;;  %v1014_v32 = vld [vmem:[#allocation2 + $0xa0] ss:$8 sps:$4 sm:$0xff]  }
  0x48   :  { %381 = vmatpush1.bf16.msra.mxu1 %v981_v10  ;;  %v1015_v33 = vld [vmem:[#allocation2 + $0x94] ss:$8 sps:$4 sm:$0xff]   ;;  %v1017_v34 = vld [vmem:[#allocation2 + $0x90] ss:$8 sps:$4 sm:$0xff]   ;;  %v1018_v35 = vld [vmem:[#allocation2 + $0x84] ss:$8 sps:$4 sm:$0xff]  }
  0x49   :  { %382 = vmatprep.subr.bf16.mxu1 %v982_v11  ;;  %v1020_v36 = vld [vmem:[#allocation2 + $0x80] ss:$8 sps:$4 sm:$0xff]   ;;  %v1021_v37 = vld [vmem:[#allocation4 + $0x70] ss:$8 sps:$4 sm:$0xff]   ;;  %v1023_v38 = vld [vmem:[#allocation4 + $0x74] ss:$8 sps:$4 sm:$0xff]  }
  0x4a   :  { %v1026_v39 = vld [vmem:[#allocation4 + $0x64] ss:$8 sps:$4 sm:$0xff]   ;;  %625 = vmatprep.subr.bf16.mxu0 %v1023_v38  ;;  %v1024_v40 = vld [vmem:[#allocation4 + $0x60] ss:$8 sps:$4 sm:$0xff]   ;;  %v1029_v41 = vld [vmem:[#allocation4 + $0x54] ss:$8 sps:$4 sm:$0xff]  }
  0x4b   :  { %626 = vmatpush1.bf16.msra.mxu0 %v1021_v37  ;;  %v1027_v42 = vld [vmem:[#allocation4 + $0x50] ss:$8 sps:$4 sm:$0xff]   ;;  %v1032_v43 = vld [vmem:[#allocation4 + $0x44] ss:$8 sps:$4 sm:$0xff]   ;;  %v1030_v44 = vld [vmem:[#allocation4 + $0x40] ss:$8 sps:$4 sm:$0xff]  }
  0x4c   :  { %383 = vmatpush1.bf16.msra.mxu1 %v984_v12  ;;  %627 = vmatprep.subr.bf16.mxu0 %v1026_v39  ;;  %v1035_v45 = vld [vmem:[#allocation4 + $0x34] ss:$8 sps:$4 sm:$0xff]   ;;  %v1033_v46 = vld [vmem:[#allocation4 + $0x30] ss:$8 sps:$4 sm:$0xff]   ;;  %v1038_v47 = vld [vmem:[#allocation4 + $0x24] ss:$8 sps:$4 sm:$0xff]  }
  0x4d   :  { %384 = vmatprep.subr.bf16.mxu1 %v985_v13  ;;  %v1036_v48 = vld [vmem:[#allocation4 + $0x20] ss:$8 sps:$4 sm:$0xff]   ;;  %v1041_v49 = vld [vmem:[#allocation4 + $0x14] ss:$8 sps:$4 sm:$0xff]   ;;  %v1039_v50 = vld [vmem:[#allocation4 + $0x10] ss:$8 sps:$4 sm:$0xff]  }
  0x4e   :  { %v1044_v51 = vld [vmem:[#allocation4 + $0x4] ss:$8 sps:$4 sm:$0xff]   ;;  %v1042_v52 = vld [vmem:[#allocation4] ss:$8 sps:$4 sm:$0xff]   ;;  %v1047_v53 = vld [vmem:[#allocation4 + $0xf4] ss:$8 sps:$4 sm:$0xff]  }
  0x4f   :  { %628 = vmatpush1.bf16.msra.mxu0 %v1024_v40  ;;  %v1045_v54 = vld [vmem:[#allocation4 + $0xf0] ss:$8 sps:$4 sm:$0xff]   ;;  %v1050_v55 = vld [vmem:[#allocation4 + $0xe4] ss:$8 sps:$4 sm:$0xff]   ;;  %v1048_v56 = vld [vmem:[#allocation4 + $0xe0] ss:$8 sps:$4 sm:$0xff]  }
  0x50   :  { %385 = vmatpush1.bf16.msra.mxu1 %v987_v14  ;;  %629 = vmatprep.subr.bf16.mxu0 %v1029_v41  ;;  %v1053_v57 = vld [vmem:[#allocation4 + $0xd4] ss:$8 sps:$4 sm:$0xff]   ;;  %v1051_v58 = vld [vmem:[#allocation4 + $0xd0] ss:$8 sps:$4 sm:$0xff]   ;;  %v1056_v59 = vld [vmem:[#allocation4 + $0xc4] ss:$8 sps:$4 sm:$0xff]  }
  0x51   :  { %386 = vmatprep.subr.bf16.mxu1 %v988_v15  ;;  %v1054_v60 = vld [vmem:[#allocation4 + $0xc0] ss:$8 sps:$4 sm:$0xff]   ;;  %v1059_v61 = vld [vmem:[#allocation4 + $0xb4] ss:$8 sps:$4 sm:$0xff]   ;;  %v1057_v62 = vld [vmem:[#allocation4 + $0xb0] ss:$8 sps:$4 sm:$0xff]  }
  0x52   :  { %v1062_v63 = vld [vmem:[#allocation4 + $0xa4] ss:$8 sps:$4 sm:$0xff]   ;;  %v1060_v0 = vld [vmem:[#allocation4 + $0xa0] ss:$8 sps:$4 sm:$0xff]   ;;  %v104_v2 = vshrl.u32 %v103_v1, 7 }
  0x53   :  { %630 = vmatpush1.bf16.msra.mxu0 %v1027_v42  ;;  %v101_v4 = vld [vmem:[%s1296_s2] sm:$0x3]  ;;  %v921_v1 = vld [vmem:[#allocation9] ss:$0 sm:$0xff] }
  0x54   :  { %387 = vmatpush1.bf16.msra.mxu1 %v990_v16  ;;  %631 = vmatprep.subr.bf16.mxu0 %v1032_v43  ;;  %v1275_v3 = vsub.s32 0, %v104_v2  ;;  %v1280_v5 = vsub.s32 1, %v104_v2 }
  0x55   :  { %388 = vmatprep.subr.bf16.mxu1 %v991_v17 }
  0x56   :  { %v106_v6 = vrot.slane %v101_v4, %v1275_v3  ;;  %v110_v7 = vrot.slane %v101_v4, %v1280_v5 }
  0x57   :  { %632 = vmatpush1.bf16.msra.mxu0 %v1030_v44 }
  0x58   :  { %389 = vmatpush1.bf16.msra.mxu1 %v993_v18  ;;  %633 = vmatprep.subr.bf16.mxu0 %v1035_v45  ;;  %v1065_v18 = vld [vmem:[#allocation4 + $0x94] ss:$8 sps:$4 sm:$0xff]  }
  0x59   :  { %390 = vmatprep.subr.bf16.mxu1 %v994_v19  ;;  %v1063_v19 = vld [vmem:[#allocation4 + $0x90] ss:$8 sps:$4 sm:$0xff]  }
  0x5b   :  { %634 = vmatpush1.bf16.msra.mxu0 %v1033_v46 }
  0x5c   :  { %391 = vmatpush1.bf16.msra.mxu1 %v996_v20  ;;  %635 = vmatprep.subr.bf16.mxu0 %v1038_v47  ;;  %v1068_v20 = vld [vmem:[#allocation4 + $0x84] ss:$8 sps:$4 sm:$0xff]  }
  0x5d   :  { %392 = vmatprep.subr.bf16.mxu1 %v997_v21  ;;  %v1066_v21 = vld [vmem:[#allocation4 + $0x80] ss:$8 sps:$4 sm:$0xff]  }
  0x5e   :  { %v1081_v47 = vld [vmem:[#allocation7 + $0x48] sm:$0xff]  }
  0x5f   :  { %636 = vmatpush1.bf16.msra.mxu0 %v1036_v48  ;;  %v1082_v48 = vld [vmem:[#allocation7 + $0x8] sm:$0xff]  }
  0x60   :  { %393 = vmatpush2.bf16.msra.mxu1 %v999_v22  ;;  %637 = vmatprep.subr.bf16.mxu0 %v1041_v49  ;;  %v1069_v22 = vld [vmem:[#allocation7 + $0x78] sm:$0xff]   ;;  %v1083_v49 = vld [vmem:[#allocation7 + $0x40] sm:$0xff]  }
  0x61   :  { %394 = vmatprep.subr.bf16.mxu1 %v1000_v23  ;;  %v1070_v23 = vld [vmem:[#allocation7 + $0x38] sm:$0xff]  }
  0x63   :  { %638 = vmatpush1.bf16.msra.mxu0 %v1039_v50  ;;  %v1084_v50 = vld [vmem:[#allocation7] sm:$0xff]  }
  0x64   :  { %395 = vmatpush2.bf16.msra.mxu1 %v1002_v24  ;;  %639 = vmatprep.subr.bf16.mxu0 %v1044_v51  ;;  %v1071_v24 = vld [vmem:[#allocation7 + $0x70] sm:$0xff]   ;;  %v453_v51 = vld [vmem:[#allocation6] sm:$0x3] }
  0x65   :  { %396 = vmatprep.subr.bf16.mxu1 %v1003_v25  ;;  %v1072_v25 = vld [vmem:[#allocation7 + $0x30] sm:$0xff]  }
  0x67   :  { %640 = vmatpush1.bf16.msra.mxu0 %v1042_v52  ;;  %v458_v52 = vrot.slane %v453_v51, %v1275_v3 }
  0x68   :  { %397 = vmatpush2.bf16.msra.mxu1 %v1005_v26  ;;  %641 = vmatprep.subr.bf16.mxu0 %v1047_v53  ;;  %v1073_v26 = vld [vmem:[#allocation7 + $0x68] sm:$0xff]   ;;  %v462_v53 = vrot.slane %v453_v51, %v1280_v5 }
  0x69   :  { %398 = vmatprep.subr.bf16.mxu1 %v1006_v27  ;;  %v1074_v27 = vld [vmem:[#allocation7 + $0x28] sm:$0xff]  }
  0x6b   :  { %642 = vmatpush2.bf16.msra.mxu0 %v1045_v54 }
  0x6c   :  { %399 = vmatpush2.bf16.msra.mxu1 %v1008_v28  ;;  %643 = vmatprep.subr.bf16.mxu0 %v1050_v55  ;;  %v1075_v28 = vld [vmem:[#allocation7 + $0x60] sm:$0xff]  }
  0x6d   :  { %400 = vmatprep.subr.bf16.mxu1 %v1009_v29  ;;  %v1076_v29 = vld [vmem:[#allocation7 + $0x20] sm:$0xff]  }
  0x6f   :  { %644 = vmatpush2.bf16.msra.mxu0 %v1048_v56 }
  0x70   :  { %401 = vmatpush2.bf16.msra.mxu1 %v1011_v30  ;;  %645 = vmatprep.subr.bf16.mxu0 %v1053_v57  ;;  %v1077_v30 = vld [vmem:[#allocation7 + $0x58] sm:$0xff]  }
  0x71   :  { %402 = vmatprep.subr.bf16.mxu1 %v1012_v31  ;;  %v1078_v31 = vld [vmem:[#allocation7 + $0x18] sm:$0xff]  }
  0x73   :  { %646 = vmatpush2.bf16.msra.mxu0 %v1051_v58 }
  0x74   :  { %403 = vmatpush2.bf16.msra.mxu1 %v1014_v32  ;;  %647 = vmatprep.subr.bf16.mxu0 %v1056_v59  ;;  %v1079_v32 = vld [vmem:[#allocation7 + $0x50] sm:$0xff]  }
  0x75   :  { %404 = vmatprep.subr.bf16.mxu1 %v1015_v33  ;;  %v1080_v33 = vld [vmem:[#allocation7 + $0x10] sm:$0xff]  }
  0x77   :  { %648 = vmatpush2.bf16.msra.mxu0 %v1054_v60 }
  0x78   :  { %405 = vmatpush2.bf16.msra.mxu1 %v1017_v34  ;;  %649 = vmatprep.subr.bf16.mxu0 %v1059_v61  ;;  %v204_v34 = vld [vmem:[%s1298_s4] sm:$0x3] }
  0x79   :  { %406 = vmatprep.subr.bf16.mxu1 %v1018_v35  ;;  %v209_v35 = vrot.slane %v204_v34, %v1275_v3 }
  0x7b   :  { %650 = vmatpush2.bf16.msra.mxu0 %v1057_v62 }
  0x7c   :  { %407 = vmatpush2.bf16.msra.mxu1 %v1020_v36  ;;  %651 = vmatprep.subr.bf16.mxu0 %v1062_v63  ;;  %v213_v36 = vrot.slane %v204_v34, %v1280_v5 }
  0x7d   :  { %938 = vmatprep.subr.bf16.mxu1 %v1069_v22 }
  0x7f   :  { %652 = vmatpush2.bf16.msra.mxu0 %v1060_v0 }
  0x80   :  { %653 = vmatprep.subr.bf16.mxu0 %v1065_v18 }
  0x83   :  { %654 = vmatpush2.bf16.msra.mxu0 %v1063_v19 }
  0x84   :  { %655 = vmatprep.subr.bf16.mxu0 %v1068_v20 }
  0x87   :  { %656 = vmatpush2.bf16.msra.mxu0 %v1066_v21 }
 0x102   :  { %v161_v8 = vpop.f32.mrf.mxu0 }
 0x103   :  { %v162_v9 = vadd.f32 %v161_v8, %v106_v6 }
 0x104   :  { %v163_v10 = vpop.f32.mrf.mxu0 }
 0x105   :  { %v164_v11 = vadd.f32 %v163_v10, %v110_v7  ;;  %v168_v12 = vmax.f32 %v162_v9, 0.0 }
 0x106   :  { %v165_v13 = vpop.f32.mrf.mxu0 }
 0x107   :  { %v169_v14 = vmax.f32 %v164_v11, 0.0  ;;  %v170_v17 = vpack.c.bf16 %v168_v12, %v168_v12 }
 0x108   :  { %v166_v15 = vpop.f32.mrf.mxu0 }
 0x109   :  { %v171_v16 = vpack.c.bf16 %v169_v14, %v169_v14 }
 0x10b   :  { %408 = vmatprep.mubr.bf16.mxu1 %v171_v16 }
 0x10c   :  { %409 = vmatmul.mubr.bf16.vlgmr.msra.gmra.mxu1 %v170_v17 }
 0x10d   :  { %939 = vmatpush3.bf16.msra.mxu1 %v1070_v23 }
 0x10e   :  { %940 = vmatprep.subr.bf16.mxu1 %v1071_v24 }
 0x111   :  { %941 = vmatpush3.bf16.msra.mxu1 %v1072_v25 }
 0x112   :  { %942 = vmatprep.subr.bf16.mxu1 %v1073_v26 }
 0x115   :  { %943 = vmatpush3.bf16.msra.mxu1 %v1074_v27 }
 0x116   :  { %944 = vmatprep.subr.bf16.mxu1 %v1075_v28 }
 0x119   :  { %945 = vmatpush3.bf16.msra.mxu1 %v1076_v29 }
 0x11a   :  { %946 = vmatprep.subr.bf16.mxu1 %v1077_v30 }
 0x11d   :  { %947 = vmatpush3.bf16.msra.mxu1 %v1078_v31 }
 0x11e   :  { %948 = vmatprep.subr.bf16.mxu1 %v1079_v32 }
 0x121   :  { %949 = vmatpush3.bf16.msra.mxu1 %v1080_v33 }
 0x122   :  { %950 = vmatprep.subr.bf16.mxu1 %v1081_v47 }
 0x125   :  { %951 = vmatpush3.bf16.msra.mxu1 %v1082_v48 }
 0x126   :  { %952 = vmatprep.subr.bf16.mxu1 %v1083_v49 }
 0x129   :  { %953 = vmatpush3.bf16.msra.mxu1 %v1084_v50 }
 0x1cc   :  { %v410_v37 = vpop.f32.mrf.mxu1 }
 0x1cd   :  { %v411_v38 = vadd.f32 %v410_v37, %v209_v35 }
 0x1ce   :  { %v412_v39 = vpop.f32.mrf.mxu1 }
 0x1cf   :  { %v413_v40 = vadd.f32 %v412_v39, %v213_v36  ;;  %v417_v41 = vmax.f32 %v411_v38, 0.0 }
 0x1d0   :  { %v414_v42 = vpop.f32.mrf.mxu1 }
 0x1d1   :  { %v418_v43 = vmax.f32 %v413_v40, 0.0  ;;  %v419_v46 = vpack.c.bf16 %v417_v41, %v417_v41 }
 0x1d2   :  { %v415_v44 = vpop.f32.mrf.mxu1 }
 0x1d3   :  { %v420_v45 = vpack.c.bf16 %v418_v43, %v418_v43 }
 0x1d5   :  { %657 = vmatprep.mubr.bf16.mxu0 %v420_v45 }
 0x1d6   :  { %658 = vmatmul.mubr.bf16.vlgmr.msra.gmra.mxu0 %v419_v46 }
 0x296   :  { %v659_v54 = vpop.f32.mrf.mxu0 }
 0x297   :  { %v660_v55 = vadd.f32 %v659_v54, %v458_v52 }
 0x298   :  { %v661_v56 = vpop.f32.mrf.mxu0 }
 0x299   :  { %v662_v57 = vadd.f32 %v661_v56, %v462_v53  ;;  %v666_v58 = vmax.f32 %v660_v55, 0.0 }
 0x29a   :  { %v663_v59 = vpop.f32.mrf.mxu0 }
 0x29b   :  { %v667_v60 = vmax.f32 %v662_v57, 0.0  ;;  %v668_v63 = vpack.c.bf16 %v666_v58, %v666_v58 }
 0x29c   :  { %v664_v61 = vpop.f32.mrf.mxu0 }
 0x29d   :  { %v669_v62 = vpack.c.bf16 %v667_v60, %v667_v60 }
 0x29f   :  { %837 = vmatprep.mubr.bf16.mxu1 %v669_v62 }
 0x2a0   :  { %838 = vmatmul.mubr.bf16.vlgmr.msra.gmra.mxu1 %v668_v63 }
 0x360   :  { %v954_v0 = vpop.f32.mrf.mxu1 }
 0x362   :  { %v955_v2 = vpop.f32.mrf.mxu1 }
 0x363   :  { %v956_v4 = vadd.f32 %v955_v2, %v954_v0 }
 0x364   :  { %v957_v6 = vpop.f32.mrf.mxu1 }
 0x365   :  { %v840_v3 = vadd.f32 %v956_v4, %v921_v1 }
 0x366   :  { %v958_v7 = vpop.f32.mrf.mxu1 }
 0x367   :  { %v845_v5 = vpack.c.bf16 %v840_v3, %v840_v3 }
 0x369   :  { %846 = vst [vmem:[%s1303_s9] sm:$0xf] %v845_v5 }
 0x36a   :  { %851 = vsyncpa [#allocation3], 1 }
 0x36b   :  { %852 = vsyncpa [#allocation5], 1 }
 0x36c   :  { %853 = vsyncpa [#allocation8], 1 }

</bundles_post_ra>
